<compile_context>
chip_gen: v6e
topology: v6e:2x2x1
jax: 0.10.0
libtpu: 0.0.40
codegen_flags: <defaults>
</compile_context>

<pallas_src>
import math

import jax
import jax.numpy as jnp
from jax import lax
from jax.experimental import pallas as pl
from jax.experimental.pallas import tpu as pltpu


_INV_SQRT2 = 1.0 / math.sqrt(2.0)
_TANH_C = math.sqrt(2.0 / math.pi)


def _gelu_exact(h):
    # x * 0.5 * (1 + erf(x / sqrt(2)))  -- matches torch.erf reference.
    return h * 0.5 * (1.0 + lax.erf(h * _INV_SQRT2))


def _gelu_tanh(h):
    # Cheap tanh approximation (1 EUP tanh + a handful of VALU ops); use when
    # torch-exactness is negotiable (review: exact-erf epilogue is VALU-bound).
    return 0.5 * h * (1.0 + jnp.tanh(_TANH_C * (h + 0.044715 * (h * h * h))))


def _make_kernel(approx_gelu):
    act = _gelu_tanh if approx_gelu else _gelu_exact

    def kernel(x_ref, w_ref, b_ref, o_ref):
        # x_ref: [tm, H], w_ref: [H, I] (resident), b_ref: [1, I] (resident), o_ref: [tm, I]
        h = jnp.dot(x_ref[...], w_ref[...], preferred_element_type=jnp.float32)
        h = h + b_ref[...].astype(jnp.float32)
        o_ref[...] = act(h).astype(o_ref.dtype)

    return kernel


def _round_up(a, m):
    return (a + m - 1) // m * m


def _vmem_bytes(tm, H, I, x_item, w_item, b_item, out_item, w_bufs, io_bufs):
    """Estimate of the kernel's VMEM footprint (bytes)."""
    return (w_bufs * H * I * w_item            # resident weight buffer(s)
            + w_bufs * I * b_item              # resident bias buffer(s)
            + io_bufs * tm * H * x_item        # streamed input tiles
            + io_bufs * tm * I * out_item      # streamed output tiles
            + 2 * tm * I * 4)                  # f32 matmul accumulator + epilogue temp


def bert_intermediate(hidden_states, weight, bias, *, tm=512,
                      approx_gelu=False, cast_inputs_to_bf16=False):
    """hidden_states: [B, S, H]; weight: [H, I]; bias: [I] -> [B, S, I]"""
    B, S, H = hidden_states.shape
    I = weight.shape[1]
    T = B * S
    out_dtype = hidden_states.dtype

    x = hidden_states.reshape(T, H)
    if cast_inputs_to_bf16 and x.dtype == jnp.float32:
        # Optional: halves HBM/VMEM traffic and unlocks full MXU throughput;
        # keep f32 accumulation inside the kernel. Off by default for exactness.
        x = x.astype(jnp.bfloat16)
        weight = weight.astype(jnp.bfloat16)
    b2d = bias.reshape(1, I)

    # --- physical VMEM per TensorCore (v5e/v6e: 128 MiB, v7x: 64 MiB) ---------
    phys_vmem = 64 << 20  # conservative fallback (safe on all generations)
    try:
        info = pltpu.get_tpu_info()
        phys_vmem = int(getattr(info, "vmem_capacity_bytes", phys_vmem))
    except Exception:
        pass
    vmem_cap = max(phys_vmem - (8 << 20), 32 << 20)   # headroom below physical

    # Sublane packing per dtype: 8 (f32), 16 (bf16), 32 (int8/fp8).
    sublane = max(8, 32 // x.dtype.itemsize)

    # Generation-aware token tile: small-VMEM parts (v7x) with f32 weights or a
    # very wide intermediate dim default to 256 rows.
    tm_max = tm
    if phys_vmem <= (64 << 20) and (weight.dtype.itemsize >= 4 or I >= 4096):
        tm_max = min(tm_max, 256)

    io_bufs = 2  # default double-buffering for the streamed x / out tiles
    tm_eff = max(sublane, min(tm_max, _round_up(T, sublane)))
    while tm_eff > sublane and _vmem_bytes(
            tm_eff, H, I, x.dtype.itemsize, weight.dtype.itemsize,
            bias.dtype.itemsize, jnp.dtype(out_dtype).itemsize,
            1, io_bufs) > vmem_cap:
        tm_eff = max(sublane, _round_up(tm_eff // 2, sublane))

    # Make sure both TensorCores get token tiles on megacore parts (grid >= 2).
    if T > sublane and pl.cdiv(T, tm_eff) < 2:
        tm_eff = max(sublane, _round_up(-(-T // 2), sublane))

    grid_m = pl.cdiv(T, tm_eff)

    kernel = _make_kernel(approx_gelu)
    cost = pl.CostEstimate(
        flops=2 * T * H * I,
        transcendentals=T * I,  # one erf/tanh per output element (advisory)
        bytes_accessed=(T * H * x.dtype.itemsize
                        + H * I * weight.dtype.itemsize
                        + I * bias.dtype.itemsize
                        + T * I * jnp.dtype(out_dtype).itemsize),
    )

    def _build(single_buffer_weight):
        w_bufs = 1 if single_buffer_weight else 2
        need = _vmem_bytes(tm_eff, H, I, x.dtype.itemsize, weight.dtype.itemsize,
                           bias.dtype.itemsize, jnp.dtype(out_dtype).itemsize,
                           w_bufs, io_bufs)
        # Always pass an explicit limit; never exceed the physical per-core VMEM.
        vmem_limit = min(max(int(need * 1.25) + (2 << 20), 32 << 20), vmem_cap)

        if single_buffer_weight:
            w_spec = pl.BlockSpec((H, I), lambda i: (0, 0),
                                  pipeline_mode=pl.Buffered(1))
            b_spec = pl.BlockSpec((1, I), lambda i: (0, 0),
                                  pipeline_mode=pl.Buffered(1))
        else:
            w_spec = pl.BlockSpec((H, I), lambda i: (0, 0))
            b_spec = pl.BlockSpec((1, I), lambda i: (0, 0))

        return pl.pallas_call(
            kernel,
            out_shape=jax.ShapeDtypeStruct((T, I), out_dtype),
            grid_spec=pltpu.PrefetchScalarGridSpec(
                num_scalar_prefetch=0,
                grid=(grid_m,),
                in_specs=[
                    pl.BlockSpec((tm_eff, H), lambda i: (i, 0)),  # x: streamed
                    w_spec,                                        # weight: resident
                    b_spec,                                        # bias: resident
                ],
                out_specs=pl.BlockSpec((tm_eff, I), lambda i: (i, 0)),
            ),
            compiler_params=pltpu.CompilerParams(
                dimension_semantics=("parallel",),
                vmem_limit_bytes=vmem_limit,
            ),
            cost_estimate=cost,
        )

    try:
        out = _build(single_buffer_weight=True)(x, weight, b2d)
    except Exception:
        # Fallback if this JAX build rejects pl.Buffered(1) for resident inputs.
        out = _build(single_buffer_weight=False)(x, weight, b2d)

    return out.reshape(B, S, I)


if __name__ == "__main__":
    # small config: batch=2, seq=8, hidden=32, intermediate=128
    B, S, H, I = 2, 8, 32, 128
    key = jax.random.PRNGKey(0)
    kx, kw, kb = jax.random.split(key, 3)

    hidden_states = jax.random.normal(kx, (B, S, H), dtype=jnp.float32)
    # deterministic parameter init (synthetic, not a checkpoint load)
    weight = jax.random.normal(kw, (H, I), dtype=jnp.float32) * 0.02
    bias = jax.random.normal(kb, (I,), dtype=jnp.float32) * 0.02

    out = bert_intermediate(hidden_states, weight, bias)
    out = jax.block_until_ready(out)

    # reference check in plain JAX (exact erf GELU, matches torch semantics)
    ref = hidden_states @ weight + bias
    ref = ref * 0.5 * (1.0 + lax.erf(ref / jnp.sqrt(2.0)))
    assert out.shape == (B, S, I)
    assert jnp.allclose(out, ref, atol=1e-5, rtol=1e-5)

    print("KERNEL_OK")
</pallas_src>

<mosaic_0001>
module attributes {stable_mosaic.version = 11 : i64} {
  func.func @kernel(%arg0: i32, %arg1: memref<8x32xf32, #tpu.memory_space<vmem>>, %arg2: memref<32x128xf32, #tpu.memory_space<vmem>>, %arg3: memref<1x128xf32, #tpu.memory_space<vmem>>, %arg4: memref<8x128xf32, #tpu.memory_space<vmem>>) attributes {dimension_semantics = [#tpu.dimension_semantics<parallel>], iteration_bounds = array<i64: 2>, scalar_prefetch = 0 : i64, scratch_operands = 0 : i64, tpu.core_type = #tpu.core_type<tc>, window_params = [{transform_indices = @transform_0, window_bounds = array<i64: 8, 32>}, {pipeline_mode = #tpu.pipeline_mode<synchronous>, transform_indices = @transform_1, window_bounds = array<i64: 32, 128>}, {pipeline_mode = #tpu.pipeline_mode<synchronous>, transform_indices = @transform_2, window_bounds = array<i64: 1, 128>}, {transform_indices = @transform_3, window_bounds = array<i64: 8, 128>}]} {
    %c0 = arith.constant 0 : index
    %c0_0 = arith.constant 0 : index
    %0 = vector.load %arg1[%c0, %c0_0] : memref<8x32xf32, #tpu.memory_space<vmem>>, vector<8x32xf32>
    %c0_1 = arith.constant 0 : index
    %c0_2 = arith.constant 0 : index
    %1 = vector.load %arg2[%c0_1, %c0_2] : memref<32x128xf32, #tpu.memory_space<vmem>>, vector<32x128xf32>
    %cst = arith.constant dense<0.000000e+00> : vector<8x128xf32>
    %2 = tpu.matmul %0, %1, %cst {dimension_numbers = #tpu.dot_dimension_numbers<[1], [0], [0], [1], [0, 0, 1, 1], [], []>} : vector<8x32xf32>, vector<32x128xf32>, vector<8x128xf32> -> vector<8x128xf32>
    %c0_3 = arith.constant 0 : index
    %c0_4 = arith.constant 0 : index
    %3 = vector.load %arg3[%c0_3, %c0_4] : memref<1x128xf32, #tpu.memory_space<vmem>>, vector<1x128xf32>
    %4 = vector.broadcast %3 : vector<1x128xf32> to vector<8x128xf32>
    %5 = arith.addf %2, %4 : vector<8x128xf32>
    %cst_5 = arith.constant 5.000000e-01 : f32
    %6 = vector.broadcast %cst_5 : f32 to vector<8x128xf32>
    %7 = arith.mulf %5, %6 : vector<8x128xf32>
    %cst_6 = arith.constant 0.707106769 : f32
    %8 = vector.broadcast %cst_6 : f32 to vector<8x128xf32>
    %9 = arith.mulf %5, %8 : vector<8x128xf32>
    %10 = math.erf %9 : vector<8x128xf32>
    %cst_7 = arith.constant 1.000000e+00 : f32
    %11 = vector.broadcast %cst_7 : f32 to vector<8x128xf32>
    %12 = arith.addf %11, %10 : vector<8x128xf32>
    %13 = arith.mulf %7, %12 : vector<8x128xf32>
    %c0_8 = arith.constant 0 : index
    %c0_9 = arith.constant 0 : index
    %14 = vector.load %arg4[%c0_8, %c0_9] : memref<8x128xf32, #tpu.memory_space<vmem>>, vector<8x128xf32>
    tpu.vector_store %arg4[%c0_8, %c0_9], %13 {strides = array<i32>} : memref<8x128xf32, #tpu.memory_space<vmem>>, vector<8x128xf32>,
    return
  }
  func.func @transform_0(%arg0: i32) -> (i32, i32) {
    %c0_i32 = arith.constant 0 : i32
    %c0_i32_0 = arith.constant 0 : i32
    return %arg0, %c0_i32 : i32, i32
  }
  func.func @transform_1(%arg0: i32) -> (i32, i32) {
    %c0_i32 = arith.constant 0 : i32
    %c0_i32_0 = arith.constant 0 : i32
    %c0_i32_1 = arith.constant 0 : i32
    return %c0_i32, %c0_i32_0 : i32, i32
  }
  func.func @transform_2(%arg0: i32) -> (i32, i32) {
    %c0_i32 = arith.constant 0 : i32
    %c0_i32_0 = arith.constant 0 : i32
    %c0_i32_1 = arith.constant 0 : i32
    return %c0_i32, %c0_i32_0 : i32, i32
  }
  func.func @transform_3(%arg0: i32) -> (i32, i32) {
    %c0_i32 = arith.constant 0 : i32
    %c0_i32_0 = arith.constant 0 : i32
    return %arg0, %c0_i32 : i32, i32
  }
}

module attributes {stable_mosaic.version = 11 : i64} {
  func.func @kernel(%arg0: i32, %arg1: memref<8x32xf32, #tpu.memory_space<vmem>>, %arg2: memref<32x128xf32, #tpu.memory_space<vmem>>, %arg3: memref<1x128xf32, #tpu.memory_space<vmem>>, %arg4: memref<8x128xf32, #tpu.memory_space<vmem>>) attributes {dimension_semantics = [#tpu.dimension_semantics<parallel>], iteration_bounds = array<i64: 2>, scalar_prefetch = 0 : i64, scratch_operands = 0 : i64, tpu.core_type = #tpu.core_type<tc>, window_params = [{transform_indices = @transform_0, window_bounds = array<i64: 8, 32>}, {pipeline_mode = #tpu.pipeline_mode<synchronous>, transform_indices = @transform_1, window_bounds = array<i64: 32, 128>}, {pipeline_mode = #tpu.pipeline_mode<synchronous>, transform_indices = @transform_2, window_bounds = array<i64: 1, 128>}, {transform_indices = @transform_3, window_bounds = array<i64: 8, 128>}]} {
    %c0 = arith.constant 0 : index
    %c0_0 = arith.constant 0 : index
    %0 = vector.load %arg1[%c0, %c0_0] : memref<8x32xf32, #tpu.memory_space<vmem>>, vector<8x32xf32>
    %c0_1 = arith.constant 0 : index
    %c0_2 = arith.constant 0 : index
    %1 = vector.load %arg2[%c0_1, %c0_2] : memref<32x128xf32, #tpu.memory_space<vmem>>, vector<32x128xf32>
    %cst = arith.constant dense<0.000000e+00> : vector<8x128xf32>
    %2 = tpu.matmul %0, %1, %cst {dimension_numbers = #tpu.dot_dimension_numbers<[1], [0], [0], [1], [0, 0, 1, 1], [], []>} : vector<8x32xf32>, vector<32x128xf32>, vector<8x128xf32> -> vector<8x128xf32>
    %c0_3 = arith.constant 0 : index
    %c0_4 = arith.constant 0 : index
    %3 = vector.load %arg3[%c0_3, %c0_4] : memref<1x128xf32, #tpu.memory_space<vmem>>, vector<1x128xf32>
    %4 = vector.broadcast %3 : vector<1x128xf32> to vector<8x128xf32>
    %5 = arith.addf %2, %4 : vector<8x128xf32>
    %cst_5 = arith.constant 5.000000e-01 : f32
    %6 = vector.broadcast %cst_5 : f32 to vector<8x128xf32>
    %7 = arith.mulf %5, %6 : vector<8x128xf32>
    %cst_6 = arith.constant 0.707106769 : f32
    %8 = vector.broadcast %cst_6 : f32 to vector<8x128xf32>
    %9 = arith.mulf %5, %8 : vector<8x128xf32>
    %10 = math.erf %9 : vector<8x128xf32>
    %cst_7 = arith.constant 1.000000e+00 : f32
    %11 = vector.broadcast %cst_7 : f32 to vector<8x128xf32>
    %12 = arith.addf %11, %10 : vector<8x128xf32>
    %13 = arith.mulf %7, %12 : vector<8x128xf32>
    %c0_8 = arith.constant 0 : index
    %c0_9 = arith.constant 0 : index
    %14 = vector.load %arg4[%c0_8, %c0_9] : memref<8x128xf32, #tpu.memory_space<vmem>>, vector<8x128xf32>
    tpu.vector_store %arg4[%c0_8, %c0_9], %13 {strides = array<i32>} : memref<8x128xf32, #tpu.memory_space<vmem>>, vector<8x128xf32>,
    return
  }
  func.func @transform_0(%arg0: i32) -> (i32, i32) {
    %c0_i32 = arith.constant 0 : i32
    %c0_i32_0 = arith.constant 0 : i32
    return %arg0, %c0_i32 : i32, i32
  }
  func.func @transform_1(%arg0: i32) -> (i32, i32) {
    %c0_i32 = arith.constant 0 : i32
    %c0_i32_0 = arith.constant 0 : i32
    %c0_i32_1 = arith.constant 0 : i32
    return %c0_i32, %c0_i32_0 : i32, i32
  }
  func.func @transform_2(%arg0: i32) -> (i32, i32) {
    %c0_i32 = arith.constant 0 : i32
    %c0_i32_0 = arith.constant 0 : i32
    %c0_i32_1 = arith.constant 0 : i32
    return %c0_i32, %c0_i32_0 : i32, i32
  }
  func.func @transform_3(%arg0: i32) -> (i32, i32) {
    %c0_i32 = arith.constant 0 : i32
    %c0_i32_0 = arith.constant 0 : i32
    return %arg0, %c0_i32 : i32, i32
  }
}

</mosaic_0001>

<bundles_post_ra>
// kernel: tpu_custom_call.1
= control target key start
LH: loop header
LB: loop body
LE: loop exit
PB: predicated region body
PF: predicated region fallthrough
CT: control target
= control target key end

     0   :  { %8 = vsyncpa [#allocation3], 0  ;;  %s794_s0 = inlined_call_operand.hbm [shape: f32[16,32], index: 0, kind: input, shape index: {}]   ;;  %s795_s1 = inlined_call_operand.hbm [shape: f32[32,128], index: 1, kind: input, shape index: {}]   ;;  %s796_s2 = inlined_call_operand.vmem [shape: f32[1,128], index: 2, kind: input, shape index: {}]   ;;  %s797_s3 = inlined_call_operand.hbm [shape: f32[16,128], index: 3, kind: output, shape index: {}]  }
   0x1   :  { %10 = vsyncpa [#allocation3 + $0x1], 0 }
   0x2   :  { %11 = vsyncpa [#allocation6], 0 }
   0x3   :  { %12 = vsyncpa [#allocation4], 0 }
   0x4   :  { %14 = vsyncpa [#allocation4 + $0x1], 0  ;;  %s633_s12 = smov 0   ;;  %s635_s13 = smov 0  }
   0x5   :  { %s637_s14 = smov 0   ;;  %s639_s15 = smov 0  }
   0x6 LB: > { %s654_s16 = sadd.s32 4294967295, %s604_s15   ;;  %s387_s17 = sadd.s32 4294967294, %s604_s15   ;;  %s604_s15 = sphi %s639_s15, %s819_s15   ;;  %s600_s14 = sphi %s637_s14, %s818_s14   ;;  %s596_s13 = sphi %s635_s13, %s817_s13   ;;  %s592_s12 = sphi %s633_s12, %s816_s12  }
   0x7   : > { %p40_p0 = scmp.ne.s32.totalorder %s596_s13, %s592_s12  ;;  %p798_p1 = scmp.eq.s32.totalorder %s654_s16, 0 }
   0x8   : > { %p112_p3 = scmp.eq.s32.totalorder %s387_s17, 1  ;;  %p388_p5 = scmp.ge.s32.totalorder %s604_s15, 1 }
   0x9   : > { %p663_p4 = por %p798_p1, %p40_p0  ;;  %p119_p7 = scmp.lt.s32.totalorder %s604_s15, 3 }
   0xa   : > { %p668_p6 = por %p112_p3, %p40_p0  ;;  %s606_s21 = smov [#allocation5]  }
   0xb   : > { %s802_s18 = scalar_select %p663_p4, 1, 0 }
   0xc   : > { %s803_s19 = scalar_select %p668_p6, 1, 0 }
   0xd   : > { %p673_p8 = pnand %p388_p5, %p119_p7  ;;  %s131_s22 = sshll.u32 %s606_s21, 4  ;;  %s132_s22 = int_to_ptr.vmem [resolvable:$true] %s131_s22 }
   0xe   : > { %s687_s24 = sadd.s32 1, %s604_s15   ;;  %s27_s25 = sadd.s32 1, %s600_s14 }
   0xf   : > { %s804_s20 = scalar_select %p673_p8, 1, 0 }
  0x10   : > { %p427_p9 = pneg %p673_p8  ;;  %s24_s26 = ssub.s32 %s604_s15, %s687_s24 }
  0x11   : > { %s493_s27 = scalar_lea.vmem %s132_s22, 512  ;;  %p501_p5 = scmp.lt.s32.totalorder %s132_s22, %s132_s22 }
  0x12   : > { %p682_p11 = pnand %p427_p9, %p798_p1  ;;  %p494_p13 = scmp.ne.s32.totalorder %s132_s22, %s493_s27 }
  0x13   : > { %p502_p7 = scmp.lt.s32.totalorder %s493_s27, %s493_s27 }
  0x14   : > { %p484_p12 = pneg %p682_p11 }
  0x15   : > { %p503_p10 = por %p502_p7, %p501_p5 }
  0x16   : > { %p496_p0 = pnand %p494_p13, %p484_p12 }
  0x18   : > { %p497_p3 = pneg %p496_p0 }
  0x1a   : > { %p504_p2 = pnand %p503_p10, %p497_p3 }
  0x1c   : > { %507 = shalt.err (!%p504_p2)
}
  0x1d   : > { %s607_s28 = smov 128   ;;  %s608_s29 = smov 8  }
  0x1e   : > { %430 = dma.hbm_to_vmem [thread:$0]  (!%p682_p11), %s795_s1, 512, %s132_s22, [#allocation6], %s607_s28, %s607_s28, %s608_s29  }
  0x1f   : > { %p25_p9 = scmp.eq.s32.totalorder %s24_s26, 0  ;;  %p34_p12 = scmp.ne.s32.totalorder %s600_s14, %s596_s13 }
  0x20   : > { %p35_p10 = scmp.eq.s32.totalorder %s604_s15, 0  ;;  %p440_p2 = scmp.lt.s32.totalorder %s604_s15, 2 }
  0x21   : > { %s704_s5 = scalar_select %p25_p9, %s600_s14, %s27_s25  }
  0x22   : > { %p36_p13 = por %p35_p10, %p34_p12  ;;  %p806_p0 = scmp.eq.s32.totalorder %s654_s16, 1 }
  0x23   : > { %s148_s7 = sand.u32 1, %s600_s14   ;;  %s392_s8 = sshll.u32 %s604_s15, 7 }
  0x24   : > { %p708_p3 = por %p806_p0, %p34_p12  ;;  %s391_s9 = sshll.u32 %s148_s7, 3 }
  0x25   : > { %s717_s17 = scalar_lea.hbm %s794_s0, %s392_s8  ;;  %s152_s21 = scalar_lea.vmem [#allocation2], %s391_s9 }
  0x26   : > { %s807_s6 = scalar_select %p708_p3, 1, 0 }
  0x27   : > { %s159_s22 = sshll.u32 %s152_s21, 4  ;;  %p719_p11 = pnand %p440_p2, %p36_p13  ;;  %s160_s22 = int_to_ptr.vmem [resolvable:$true] %s159_s22 }
  0x28   : > { %s149_s25 = scalar_lea.sflag [#allocation3], %s148_s7  ;;  %s508_s26 = scalar_lea.hbm %s717_s17, 128 }
  0x29   : > { %p509_p5 = scmp.ne.s32.totalorder %s717_s17, %s508_s26  ;;  %p510_p7 = pneg %p719_p11 }
  0x2a   : > { %s513_s29 = scalar_lea.hbm %s794_s0, 256  ;;  %p514_p10 = scmp.lt.s32.totalorder %s717_s17, %s794_s0 }
  0x2b   : > { %p511_p9 = pnand %p510_p7, %p509_p5  ;;  %p515_p2 = scmp.lt.s32.totalorder %s513_s29, %s508_s26 }
  0x2d   : > { %p512_p12 = pneg %p511_p9  ;;  %p516_p13 = por %p515_p2, %p514_p10 }
  0x2f   : > { %p517_p0 = pnand %p516_p13, %p512_p12 }
  0x31   : > { %520 = shalt.err (!%p517_p0)
}
  0x32   : > { %s521_s8 = scalar_lea.vmem %s160_s22, 128  ;;  %s609_s7 = smov [#allocation2]  }
  0x33   : > { %p522_p1 = scmp.ne.s32.totalorder %s160_s22, %s521_s8  ;;  %s526_s9 = sshll.u32 %s609_s7, 4  ;;  %s527_s9 = int_to_ptr.vmem [resolvable:$false] %s526_s9 }
  0x34   : > { %s528_s10 = scalar_lea.vmem %s527_s9, 256  ;;  %p529_p5 = scmp.lt.s32.totalorder %s160_s22, %s527_s9 }
  0x35   : > { %p524_p6 = pnand %p522_p1, %p510_p7  ;;  %p530_p9 = scmp.lt.s32.totalorder %s528_s10, %s521_s8 }
  0x37   : > { %p525_p3 = pneg %p524_p6  ;;  %p531_p4 = por %p530_p9, %p529_p5 }
  0x39   : > { %p532_p8 = pnand %p531_p4, %p525_p3 }
  0x3b   : > { %535 = shalt.err (!%p532_p8)
}
  0x3c   : > { %434 = dma.hbm_to_vmem [thread:$0]  (!%p719_p11), %s717_s17, 128, %s160_s22, %s149_s25  }
  0x3d   : > { %p809_p12 = scmp.ne.s32.totalorder %s804_s20, 0 }
  0x3e   : > { %s740_s11 = sand.u32 (!%p809_p12), 1, %s596_s13   ;;  %p810_p1 = scmp.ne.s32.totalorder (!%p809_p12), %s802_s18, 0 }
  0x3f   : > { %168 = sbr.rel (%p809_p12) target bundleno = 309 (0x135), region = 32  ;;  %s394_s21 = sshll.u32 (!%p809_p12), %s740_s11, 3 }
  0x40   : > { %s171_s26 = scalar_lea.sflag (!%p809_p12), [#allocation3], %s740_s11  ;;  %s174_s27 = scalar_lea.vmem (!%p809_p12), [#allocation2], %s394_s21 }
  0x44   : > { %579 = dma.done.wait (%p810_p1), %s171_s26, 128  }
  0x45   : > { %581 = vsyncadd (%p810_p1), %s171_s26, 4294967168  ;;  %p811_p4 = scmp.eq.s32.totalorder %s654_s16, 0 }
  0x47   : > { %583 = dma.done.wait (%p811_p4), [#allocation6], 512   ;;  %p812_p6 = pmov %p811_p4 }
  0x48   : > { %v610_v0 = vmov 0.0   ;;  %vm611_vm0 = vmmov 0   ;;  %v205_v1 = vld [vmem:[#allocation5 + $0x18] sm:$0xff]  ;;  %v204_v2 = vld [vmem:[#allocation5 + $0x10] sm:$0xff]  ;;  %v203_v3 = vld [vmem:[#allocation5 + $0x8] sm:$0xff]  ;;  %vm213_vm1 = vcmask 261120  }
  0x49   : > { %585 = vsyncadd (%p812_p6), [#allocation6], 4294966784  ;;  %408 = vmatprep.subr.mxu0 %v610_v0  ;;  %416 = vmatprep.mubr.msk.f32.mxu0 %vm611_vm0, %v610_v0  ;;  %v202_v4 = vld [vmem:[#allocation5] sm:$0xff]  ;;  %v201_v5 = vld [vmem:[%s174_s27] sm:$0xff]  ;;  %s400_s17 = sshll.u32 %s654_s16, 7  ;;  %s200_s22 = scalar_lea.vmem [#allocation7], %s394_s21 }
  0x4a   : > { %409 = vmatpush3.msra.mxu0 %v205_v1  ;;  %v397_v6 = vld [vmem:[%s796_s2] ss:$0 sm:$0xff]  ;;  %s307_s23 = sshll.u32 %s200_s22, 4  ;;  %s305_s29 = scalar_lea.hbm %s797_s3, %s400_s17  ;;  %s308_s23 = int_to_ptr.vmem [resolvable:$true] %s307_s23 }
  0x4b   : > { %410 = vmatprep.subr.mxu0 %v610_v0  ;;  %s294_s30 = scalar_lea.sflag [#allocation4], %s740_s11  ;;  %s536_s4 = scalar_lea.vmem %s308_s23, 128 }
  0x4c   : > { %411 = vmatpush3.msra.mxu0 %v204_v2  ;;  %p537_p8 = scmp.ne.s32.totalorder %s308_s23, %s536_s4  ;;  %p813_p3 = scmp.ne.s32.totalorder %s807_s6, 0 }
  0x4d   : > { %412 = vmatprep.subr.mxu0 %v610_v0  ;;  %s612_s8 = smov [#allocation7]  }
  0x4e   : > { %413 = vmatpush3.msra.mxu0 %v203_v3  ;;  %p538_p11 = pnand %p537_p8, %p813_p3  ;;  %s540_s16 = sshll.u32 %s612_s8, 4  ;;  %s541_s16 = int_to_ptr.vmem [resolvable:$false] %s540_s16 }
  0x4f   : > { %414 = vmatprep.subr.mxu0 %v610_v0  ;;  %s542_s7 = scalar_lea.vmem %s541_s16, 256  ;;  %p543_p10 = scmp.lt.s32.totalorder %s308_s23, %s541_s16 }
  0x50   : > { %415 = vmatpush3.msra.mxu0 %v202_v4  ;;  %p539_p7 = pneg %p538_p11  ;;  %p544_p2 = scmp.lt.s32.totalorder %s542_s7, %s536_s4 }
  0x51   : > { %417 = vmatmul.mubr.msk.f32.vlgmr.msra.gmra.mxu0 %vm213_vm1, %v201_v5 }
  0x52   : > { %p545_p13 = por %p544_p2, %p543_p10 }
  0x54   : > { %p546_p0 = pnand %p545_p13, %p539_p7 }
 0x111   : > { %v283_v7 = vpop.f32.mrf.mxu0 }
 0x112   : > { %v284_v8 = vadd.f32 %v397_v6, %v283_v7 }
 0x113   : > { %v418_v9 = vpop.f32.mrf.mxu0 }
 0x114   : > { %v288_v10 = vmul.f32 0.70710677, %v284_v8  ;;  %v287_v12 = vmul.f32 0.5, %v284_v8 }
 0x116   : > { %480 = verf.f32 %v288_v10 }
 0x123   : > { %v481_v11 = vpop.eup %480 }
 0x124   : > { %v290_v13 = vadd.f32 1.0, %v481_v11 }
 0x126   : > { %v291_v14 = vmul.f32 %v290_v13, %v287_v12 }
 0x128   : > { %292 = vst [vmem:[%s200_s22] sm:$0xff] %v291_v14 }
 0x129   : > { %549 = shalt.err (!%p546_p0)
}
 0x12a   : > { %s550_s9 = scalar_lea.hbm %s305_s29, 128  ;;  %s554_s21 = scalar_lea.hbm %s797_s3, 256 }
 0x12b   : > { %p551_p5 = scmp.ne.s32.totalorder %s305_s29, %s550_s9  ;;  %p555_p1 = scmp.lt.s32.totalorder %s305_s29, %s797_s3 }
 0x12c   : > { %p556_p4 = scmp.lt.s32.totalorder %s554_s21, %s550_s9 }
 0x12d   : > { %p552_p9 = pnand %p551_p5, %p813_p3 }
 0x12e   : > { %p557_p6 = por %p556_p4, %p555_p1 }
 0x12f   : > { %p553_p12 = pneg %p552_p9 }
 0x131   : > { %p558_p8 = pnand %p557_p6, %p553_p12 }
 0x133   : > { %561 = shalt.err (!%p558_p8)
}
 0x134   : > { %425 = dma.vmem_to_hbm [thread:$0]  (%p813_p3), %s308_s23, 128, %s305_s29, %s294_s30  }
 0x135 PF: > { %s319_s18 = sand.u32 1, %s592_s12   ;;  %p814_p11 = scmp.ne.s32.totalorder %s803_s19, 0 }
 0x136   : > { %p815_p7 = scmp.ge.s32.totalorder %s604_s15, 2  ;;  %s320_s20 = scalar_lea.sflag [#allocation4], %s319_s18 }
 0x138   : > { %p436_p10 = pnand %p815_p7, %p814_p11 }
 0x13a   : > { %p437_p2 = pneg %p436_p10 }
 0x13c   : > { %587 = dma.done.wait (%p437_p2), %s320_s20, 128  }
 0x13d   : > { %589 = vsyncadd (%p437_p2), %s320_s20, 4294967168  ;;  %p17_p13 = scmp.ge.s32.totalorder %s687_s24, 4   ;;  %s816_s12 = smov %s596_s13 }
 0x13e   : > { %s817_s13 = smov %s600_s14  ;;  %s818_s14 = smov %s704_s5 }
 0x13f   : > { %s819_s15 = smov %s687_s24  ;;  %19 = sbr.rel (!%p17_p13) target bundleno = 6 (0x6), region = 81 }
 0x144   :  { %325 = vsyncpa [#allocation3], 1 }
 0x145   :  { %327 = vsyncpa [#allocation3 + $0x1], 1 }
 0x146   :  { %328 = vsyncpa [#allocation6], 1 }
 0x147   :  { %329 = vsyncpa [#allocation4], 1 }
 0x148   :  { %331 = vsyncpa [#allocation4 + $0x1], 1 }

// kernel: tpu_custom_call.1
= control target key start
LH: loop header
LB: loop body
LE: loop exit
PB: predicated region body
PF: predicated region fallthrough
CT: control target
= control target key end

     0   :  { %8 = vsyncpa [#allocation3], 0  ;;  %s794_s0 = inlined_call_operand.hbm [shape: f32[16,32], index: 0, kind: input, shape index: {}]   ;;  %s795_s1 = inlined_call_operand.hbm [shape: f32[32,128], index: 1, kind: input, shape index: {}]   ;;  %s796_s2 = inlined_call_operand.vmem [shape: f32[1,128], index: 2, kind: input, shape index: {}]   ;;  %s797_s3 = inlined_call_operand.hbm [shape: f32[16,128], index: 3, kind: output, shape index: {}]  }
   0x1   :  { %10 = vsyncpa [#allocation3 + $0x1], 0 }
   0x2   :  { %11 = vsyncpa [#allocation6], 0 }
   0x3   :  { %12 = vsyncpa [#allocation4], 0 }
   0x4   :  { %14 = vsyncpa [#allocation4 + $0x1], 0  ;;  %s633_s12 = smov 0   ;;  %s635_s13 = smov 0  }
   0x5   :  { %s637_s14 = smov 0   ;;  %s639_s15 = smov 0  }
   0x6 LB: > { %s654_s16 = sadd.s32 4294967295, %s604_s15   ;;  %s387_s17 = sadd.s32 4294967294, %s604_s15   ;;  %s604_s15 = sphi %s639_s15, %s819_s15   ;;  %s600_s14 = sphi %s637_s14, %s818_s14   ;;  %s596_s13 = sphi %s635_s13, %s817_s13   ;;  %s592_s12 = sphi %s633_s12, %s816_s12  }
   0x7   : > { %p40_p0 = scmp.ne.s32.totalorder %s596_s13, %s592_s12  ;;  %p798_p1 = scmp.eq.s32.totalorder %s654_s16, 0 }
   0x8   : > { %p112_p3 = scmp.eq.s32.totalorder %s387_s17, 1  ;;  %p388_p5 = scmp.ge.s32.totalorder %s604_s15, 1 }
   0x9   : > { %p663_p4 = por %p798_p1, %p40_p0  ;;  %p119_p7 = scmp.lt.s32.totalorder %s604_s15, 3 }
   0xa   : > { %p668_p6 = por %p112_p3, %p40_p0  ;;  %s606_s21 = smov [#allocation5]  }
   0xb   : > { %s802_s18 = scalar_select %p663_p4, 1, 0 }
   0xc   : > { %s803_s19 = scalar_select %p668_p6, 1, 0 }
   0xd   : > { %p673_p8 = pnand %p388_p5, %p119_p7  ;;  %s131_s22 = sshll.u32 %s606_s21, 4  ;;  %s132_s22 = int_to_ptr.vmem [resolvable:$true] %s131_s22 }
   0xe   : > { %s687_s24 = sadd.s32 1, %s604_s15   ;;  %s27_s25 = sadd.s32 1, %s600_s14 }
   0xf   : > { %s804_s20 = scalar_select %p673_p8, 1, 0 }
  0x10   : > { %p427_p9 = pneg %p673_p8  ;;  %s24_s26 = ssub.s32 %s604_s15, %s687_s24 }
  0x11   : > { %s493_s27 = scalar_lea.vmem %s132_s22, 512  ;;  %p501_p5 = scmp.lt.s32.totalorder %s132_s22, %s132_s22 }
  0x12   : > { %p682_p11 = pnand %p427_p9, %p798_p1  ;;  %p494_p13 = scmp.ne.s32.totalorder %s132_s22, %s493_s27 }
  0x13   : > { %p502_p7 = scmp.lt.s32.totalorder %s493_s27, %s493_s27 }
  0x14   : > { %p484_p12 = pneg %p682_p11 }
  0x15   : > { %p503_p10 = por %p502_p7, %p501_p5 }
  0x16   : > { %p496_p0 = pnand %p494_p13, %p484_p12 }
  0x18   : > { %p497_p3 = pneg %p496_p0 }
  0x1a   : > { %p504_p2 = pnand %p503_p10, %p497_p3 }
  0x1c   : > { %507 = shalt.err (!%p504_p2)
}
  0x1d   : > { %s607_s28 = smov 128   ;;  %s608_s29 = smov 8  }
  0x1e   : > { %430 = dma.hbm_to_vmem [thread:$0]  (!%p682_p11), %s795_s1, 512, %s132_s22, [#allocation6], %s607_s28, %s607_s28, %s608_s29  }
  0x1f   : > { %p25_p9 = scmp.eq.s32.totalorder %s24_s26, 0  ;;  %p34_p12 = scmp.ne.s32.totalorder %s600_s14, %s596_s13 }
  0x20   : > { %p35_p10 = scmp.eq.s32.totalorder %s604_s15, 0  ;;  %p440_p2 = scmp.lt.s32.totalorder %s604_s15, 2 }
  0x21   : > { %s704_s5 = scalar_select %p25_p9, %s600_s14, %s27_s25  }
  0x22   : > { %p36_p13 = por %p35_p10, %p34_p12  ;;  %p806_p0 = scmp.eq.s32.totalorder %s654_s16, 1 }
  0x23   : > { %s148_s7 = sand.u32 1, %s600_s14   ;;  %s392_s8 = sshll.u32 %s604_s15, 7 }
  0x24   : > { %p708_p3 = por %p806_p0, %p34_p12  ;;  %s391_s9 = sshll.u32 %s148_s7, 3 }
  0x25   : > { %s717_s17 = scalar_lea.hbm %s794_s0, %s392_s8  ;;  %s152_s21 = scalar_lea.vmem [#allocation2], %s391_s9 }
  0x26   : > { %s807_s6 = scalar_select %p708_p3, 1, 0 }
  0x27   : > { %s159_s22 = sshll.u32 %s152_s21, 4  ;;  %p719_p11 = pnand %p440_p2, %p36_p13  ;;  %s160_s22 = int_to_ptr.vmem [resolvable:$true] %s159_s22 }
  0x28   : > { %s149_s25 = scalar_lea.sflag [#allocation3], %s148_s7  ;;  %s508_s26 = scalar_lea.hbm %s717_s17, 128 }
  0x29   : > { %p509_p5 = scmp.ne.s32.totalorder %s717_s17, %s508_s26  ;;  %p510_p7 = pneg %p719_p11 }
  0x2a   : > { %s513_s29 = scalar_lea.hbm %s794_s0, 256  ;;  %p514_p10 = scmp.lt.s32.totalorder %s717_s17, %s794_s0 }
  0x2b   : > { %p511_p9 = pnand %p510_p7, %p509_p5  ;;  %p515_p2 = scmp.lt.s32.totalorder %s513_s29, %s508_s26 }
  0x2d   : > { %p512_p12 = pneg %p511_p9  ;;  %p516_p13 = por %p515_p2, %p514_p10 }
  0x2f   : > { %p517_p0 = pnand %p516_p13, %p512_p12 }
  0x31   : > { %520 = shalt.err (!%p517_p0)
}
  0x32   : > { %s521_s8 = scalar_lea.vmem %s160_s22, 128  ;;  %s609_s7 = smov [#allocation2]  }
  0x33   : > { %p522_p1 = scmp.ne.s32.totalorder %s160_s22, %s521_s8  ;;  %s526_s9 = sshll.u32 %s609_s7, 4  ;;  %s527_s9 = int_to_ptr.vmem [resolvable:$false] %s526_s9 }
  0x34   : > { %s528_s10 = scalar_lea.vmem %s527_s9, 256  ;;  %p529_p5 = scmp.lt.s32.totalorder %s160_s22, %s527_s9 }
  0x35   : > { %p524_p6 = pnand %p522_p1, %p510_p7  ;;  %p530_p9 = scmp.lt.s32.totalorder %s528_s10, %s521_s8 }
  0x37   : > { %p525_p3 = pneg %p524_p6  ;;  %p531_p4 = por %p530_p9, %p529_p5 }
  0x39   : > { %p532_p8 = pnand %p531_p4, %p525_p3 }
  0x3b   : > { %535 = shalt.err (!%p532_p8)
}
  0x3c   : > { %434 = dma.hbm_to_vmem [thread:$0]  (!%p719_p11), %s717_s17, 128, %s160_s22, %s149_s25  }
  0x3d   : > { %p809_p12 = scmp.ne.s32.totalorder %s804_s20, 0 }
  0x3e   : > { %s740_s11 = sand.u32 (!%p809_p12), 1, %s596_s13   ;;  %p810_p1 = scmp.ne.s32.totalorder (!%p809_p12), %s802_s18, 0 }
  0x3f   : > { %168 = sbr.rel (%p809_p12) target bundleno = 309 (0x135), region = 32  ;;  %s394_s21 = sshll.u32 (!%p809_p12), %s740_s11, 3 }
  0x40   : > { %s171_s26 = scalar_lea.sflag (!%p809_p12), [#allocation3], %s740_s11  ;;  %s174_s27 = scalar_lea.vmem (!%p809_p12), [#allocation2], %s394_s21 }
  0x44   : > { %579 = dma.done.wait (%p810_p1), %s171_s26, 128  }
  0x45   : > { %581 = vsyncadd (%p810_p1), %s171_s26, 4294967168  ;;  %p811_p4 = scmp.eq.s32.totalorder %s654_s16, 0 }
  0x47   : > { %583 = dma.done.wait (%p811_p4), [#allocation6], 512   ;;  %p812_p6 = pmov %p811_p4 }
  0x48   : > { %v610_v0 = vmov 0.0   ;;  %vm611_vm0 = vmmov 0   ;;  %v205_v1 = vld [vmem:[#allocation5 + $0x18] sm:$0xff]  ;;  %v204_v2 = vld [vmem:[#allocation5 + $0x10] sm:$0xff]  ;;  %v203_v3 = vld [vmem:[#allocation5 + $0x8] sm:$0xff]  ;;  %vm213_vm1 = vcmask 261120  }
  0x49   : > { %585 = vsyncadd (%p812_p6), [#allocation6], 4294966784  ;;  %408 = vmatprep.subr.mxu0 %v610_v0  ;;  %416 = vmatprep.mubr.msk.f32.mxu0 %vm611_vm0, %v610_v0  ;;  %v202_v4 = vld [vmem:[#allocation5] sm:$0xff]  ;;  %v201_v5 = vld [vmem:[%s174_s27] sm:$0xff]  ;;  %s400_s17 = sshll.u32 %s654_s16, 7  ;;  %s200_s22 = scalar_lea.vmem [#allocation7], %s394_s21 }
  0x4a   : > { %409 = vmatpush3.msra.mxu0 %v205_v1  ;;  %v397_v6 = vld [vmem:[%s796_s2] ss:$0 sm:$0xff]  ;;  %s307_s23 = sshll.u32 %s200_s22, 4  ;;  %s305_s29 = scalar_lea.hbm %s797_s3, %s400_s17  ;;  %s308_s23 = int_to_ptr.vmem [resolvable:$true] %s307_s23 }
  0x4b   : > { %410 = vmatprep.subr.mxu0 %v610_v0  ;;  %s294_s30 = scalar_lea.sflag [#allocation4], %s740_s11  ;;  %s536_s4 = scalar_lea.vmem %s308_s23, 128 }
  0x4c   : > { %411 = vmatpush3.msra.mxu0 %v204_v2  ;;  %p537_p8 = scmp.ne.s32.totalorder %s308_s23, %s536_s4  ;;  %p813_p3 = scmp.ne.s32.totalorder %s807_s6, 0 }
  0x4d   : > { %412 = vmatprep.subr.mxu0 %v610_v0  ;;  %s612_s8 = smov [#allocation7]  }
  0x4e   : > { %413 = vmatpush3.msra.mxu0 %v203_v3  ;;  %p538_p11 = pnand %p537_p8, %p813_p3  ;;  %s540_s16 = sshll.u32 %s612_s8, 4  ;;  %s541_s16 = int_to_ptr.vmem [resolvable:$false] %s540_s16 }
  0x4f   : > { %414 = vmatprep.subr.mxu0 %v610_v0  ;;  %s542_s7 = scalar_lea.vmem %s541_s16, 256  ;;  %p543_p10 = scmp.lt.s32.totalorder %s308_s23, %s541_s16 }
  0x50   : > { %415 = vmatpush3.msra.mxu0 %v202_v4  ;;  %p539_p7 = pneg %p538_p11  ;;  %p544_p2 = scmp.lt.s32.totalorder %s542_s7, %s536_s4 }
  0x51   : > { %417 = vmatmul.mubr.msk.f32.vlgmr.msra.gmra.mxu0 %vm213_vm1, %v201_v5 }
  0x52   : > { %p545_p13 = por %p544_p2, %p543_p10 }
  0x54   : > { %p546_p0 = pnand %p545_p13, %p539_p7 }
 0x111   : > { %v283_v7 = vpop.f32.mrf.mxu0 }
 0x112   : > { %v284_v8 = vadd.f32 %v397_v6, %v283_v7 }
 0x113   : > { %v418_v9 = vpop.f32.mrf.mxu0 }
 0x114   : > { %v288_v10 = vmul.f32 0.70710677, %v284_v8  ;;  %v287_v12 = vmul.f32 0.5, %v284_v8 }
 0x116   : > { %480 = verf.f32 %v288_v10 }
 0x123   : > { %v481_v11 = vpop.eup %480 }
 0x124   : > { %v290_v13 = vadd.f32 1.0, %v481_v11 }
 0x126   : > { %v291_v14 = vmul.f32 %v290_v13, %v287_v12 }
 0x128   : > { %292 = vst [vmem:[%s200_s22] sm:$0xff] %v291_v14 }
 0x129   : > { %549 = shalt.err (!%p546_p0)
}
 0x12a   : > { %s550_s9 = scalar_lea.hbm %s305_s29, 128  ;;  %s554_s21 = scalar_lea.hbm %s797_s3, 256 }
 0x12b   : > { %p551_p5 = scmp.ne.s32.totalorder %s305_s29, %s550_s9  ;;  %p555_p1 = scmp.lt.s32.totalorder %s305_s29, %s797_s3 }
 0x12c   : > { %p556_p4 = scmp.lt.s32.totalorder %s554_s21, %s550_s9 }
 0x12d   : > { %p552_p9 = pnand %p551_p5, %p813_p3 }
 0x12e   : > { %p557_p6 = por %p556_p4, %p555_p1 }
 0x12f   : > { %p553_p12 = pneg %p552_p9 }
 0x131   : > { %p558_p8 = pnand %p557_p6, %p553_p12 }
 0x133   : > { %561 = shalt.err (!%p558_p8)
}
 0x134   : > { %425 = dma.vmem_to_hbm [thread:$0]  (%p813_p3), %s308_s23, 128, %s305_s29, %s294_s30  }
 0x135 PF: > { %s319_s18 = sand.u32 1, %s592_s12   ;;  %p814_p11 = scmp.ne.s32.totalorder %s803_s19, 0 }
 0x136   : > { %p815_p7 = scmp.ge.s32.totalorder %s604_s15, 2  ;;  %s320_s20 = scalar_lea.sflag [#allocation4], %s319_s18 }
 0x138   : > { %p436_p10 = pnand %p815_p7, %p814_p11 }
 0x13a   : > { %p437_p2 = pneg %p436_p10 }
 0x13c   : > { %587 = dma.done.wait (%p437_p2), %s320_s20, 128  }
 0x13d   : > { %589 = vsyncadd (%p437_p2), %s320_s20, 4294967168  ;;  %p17_p13 = scmp.ge.s32.totalorder %s687_s24, 4   ;;  %s816_s12 = smov %s596_s13 }
 0x13e   : > { %s817_s13 = smov %s600_s14  ;;  %s818_s14 = smov %s704_s5 }
 0x13f   : > { %s819_s15 = smov %s687_s24  ;;  %19 = sbr.rel (!%p17_p13) target bundleno = 6 (0x6), region = 81 }
 0x144   :  { %325 = vsyncpa [#allocation3], 1 }
 0x145   :  { %327 = vsyncpa [#allocation3 + $0x1], 1 }
 0x146   :  { %328 = vsyncpa [#allocation6], 1 }
 0x147   :  { %329 = vsyncpa [#allocation4], 1 }
 0x148   :  { %331 = vsyncpa [#allocation4 + $0x1], 1 }

</bundles_post_ra>
